<compile_context>
chip_gen: v7x
topology: tpu7x:2x2x1
jax: 0.10.0
libtpu: 0.0.40
codegen_flags: <defaults>
</compile_context>

<pallas_src>
import math

import jax
import jax.numpy as jnp
from jax.experimental import pallas as pl
from jax.experimental.pallas import tpu as pltpu


def _round_up(x, mult):
    return ((x + mult - 1) // mult) * mult


_VMEM_SOFT_BUDGET = 48 << 20  # conservative across v5e / v6e / v7x


def _pick_batch_tile(n, d, tm_max, itemsize):
    """Pick a sublane-aligned batch tile: even tiles, >=2 grid steps, VMEM-safe."""
    # Per batch row: x tile (2 pipeline buffers) + out tile (2 buffers).
    bytes_per_row = 2 * 2 * d * itemsize
    # Resident operands: W.T (double-buffered by default) + diag + b.
    resident = 2 * d * d * itemsize + 4 * d * itemsize
    avail = max(_VMEM_SOFT_BUDGET - resident, 8 * bytes_per_row)
    tm_cap = max(8, (avail // bytes_per_row) // 8 * 8)
    tm_max = max(8, min(tm_max, tm_cap))

    # Evenly sized tiles (avoid padding a near-full tile), and >= 2 tiles when
    # there is enough work so v7x's two TensorCores both get a share.
    n_tiles = pl.cdiv(n, tm_max)
    if n > 8:
        n_tiles = max(n_tiles, 2)
    return _round_up(pl.cdiv(n, n_tiles), 8)


def _feature_regression_kernel(x_ref, wt_ref, diag_ref, b_ref, o_ref):
    x = x_ref[...]                                           # (TM, D)
    # Plain (TM, K) @ (K, N) on the MXU with f32 accumulation; wt_ref is W.T
    # (pre-transposed in the wrapper), fed straight from VMEM (no extra copy).
    acc = jax.lax.dot_general(
        x, wt_ref[...],
        dimension_numbers=(((1,), (0,)), ((), ())),
        preferred_element_type=jnp.float32,
    )                                                        # (TM, D)
    # Remove the self-regression (diagonal) term and add the bias — cheap VPU
    # work that hides under the MXU.
    acc = acc - x.astype(jnp.float32) * diag_ref[...].astype(jnp.float32)
    o_ref[...] = (acc + b_ref[...].astype(jnp.float32)).astype(o_ref.dtype)


def feature_regression(x, W, b, *, tm=2048):
    """z_h = x @ (W * (1 - I)).T + b  as a batch-tiled Pallas TPU kernel."""
    N, D = x.shape
    assert W.shape == (D, D) and b.shape == (D,)
    itemsize = jnp.dtype(x.dtype).itemsize

    # One-time wrapper-side prep (W is reused by every batch tile):
    wt = W.T                               # so the kernel issues (TM,K)@(K,N)
    diag = jnp.diagonal(W).reshape(1, D)   # self-regression correction term
    b2d = b.reshape(1, D)                  # keep >= 2D for VMEM layout

    tm = _pick_batch_tile(N, D, tm, itemsize)
    n_pad = _round_up(N, tm)
    x_in = jnp.pad(x, ((0, n_pad - N), (0, 0))) if n_pad != N else x
    grid = (n_pad // tm,)

    # Explicit VMEM budget (double-buffered x/out + resident W.T/diag/b + slack)
    # instead of the 16/32 MiB scoped defaults; capped at v7x's 64 MiB.
    vmem_est = (2 * tm * D * itemsize          # x, double-buffered
                + 2 * tm * D * itemsize        # out, double-buffered
                + 2 * D * D * itemsize         # W.T
                + 4 * D * itemsize             # diag + b
                + (2 << 20))                   # slack for internal scratch
    vmem_limit = int(min(max(vmem_est, 16 << 20), 64 << 20))

    out = pl.pallas_call(
        _feature_regression_kernel,
        out_shape=jax.ShapeDtypeStruct((n_pad, D), x.dtype),
        grid=grid,
        in_specs=[
            pl.BlockSpec((tm, D), lambda i: (i, 0)),   # x: streamed per tile
            pl.BlockSpec((D, D), lambda i: (0, 0)),    # W.T: resident
            pl.BlockSpec((1, D), lambda i: (0, 0)),    # diag(W): resident
            pl.BlockSpec((1, D), lambda i: (0, 0)),    # b: resident
        ],
        out_specs=pl.BlockSpec((tm, D), lambda i: (i, 0)),
        compiler_params=pltpu.CompilerParams(
            # Batch tiles are independent -> parallel (megacore-friendly).
            dimension_semantics=("parallel",),
            vmem_limit_bytes=vmem_limit,
        ),
    )(x_in, wt, diag, b2d)

    return out[:N] if n_pad != N else out


def init_params(key, input_size, dtype=jnp.float32):
    """Deterministic init matching reset_parameters(): U(-stdv, stdv)."""
    stdv = 1.0 / math.sqrt(input_size)
    k_w, k_b = jax.random.split(key)
    W = jax.random.uniform(
        k_w, (input_size, input_size), dtype=dtype, minval=-stdv, maxval=stdv
    )
    b = jax.random.uniform(
        k_b, (input_size,), dtype=dtype, minval=-stdv, maxval=stdv
    )
    return W, b


if __name__ == "__main__":
    key = jax.random.PRNGKey(0)
    k_x, k_p = jax.random.split(key)

    # Small but lane-dense shapes: D = 256 fills the 256-wide MXU on v6e/v7x
    # and keeps output stores unmasked; batch = 64 gives 2 grid tiles so the
    # "parallel" axis exercises the multi-tile / megacore path.
    batch = 64
    input_size = 256

    x = jax.random.normal(k_x, (batch, input_size), dtype=jnp.float32)
    W, b = init_params(k_p, input_size)

    out = feature_regression(x, W, b)
    out = jax.block_until_ready(out)

    # Reference check in plain JAX (same math as F.linear(x, W*m, b)).
    m = (jnp.ones((input_size, input_size), dtype=W.dtype)
         - jnp.eye(input_size, dtype=W.dtype))
    ref = jnp.matmul(x, (W * m).T, precision="highest") + b
    assert out.shape == (batch, input_size)
    assert jnp.allclose(out, ref, atol=1e-4, rtol=1e-4)

    print("KERNEL_OK")
</pallas_src>

<mosaic_0001>
module attributes {stable_mosaic.version = 11 : i64} {
  func.func @_feature_regression_kernel(%arg0: i32, %arg1: memref<32x256xf32, #tpu.memory_space<vmem>>, %arg2: memref<256x256xf32, #tpu.memory_space<vmem>>, %arg3: memref<1x256xf32, #tpu.memory_space<vmem>>, %arg4: memref<1x256xf32, #tpu.memory_space<vmem>>, %arg5: memref<32x256xf32, #tpu.memory_space<vmem>>) attributes {dimension_semantics = [#tpu.dimension_semantics<parallel>], iteration_bounds = array<i64: 2>, scalar_prefetch = 0 : i64, scratch_operands = 0 : i64, tpu.core_type = #tpu.core_type<tc>, window_params = [{transform_indices = @transform_0, window_bounds = array<i64: 32, 256>}, {pipeline_mode = #tpu.pipeline_mode<synchronous>, transform_indices = @transform_1, window_bounds = array<i64: 256, 256>}, {pipeline_mode = #tpu.pipeline_mode<synchronous>, transform_indices = @transform_2, window_bounds = array<i64: 1, 256>}, {pipeline_mode = #tpu.pipeline_mode<synchronous>, transform_indices = @transform_3, window_bounds = array<i64: 1, 256>}, {transform_indices = @transform_4, window_bounds = array<i64: 32, 256>}]} {
    %c0 = arith.constant 0 : index
    %c0_0 = arith.constant 0 : index
    %0 = vector.load %arg1[%c0, %c0_0] : memref<32x256xf32, #tpu.memory_space<vmem>>, vector<32x256xf32>
    %c0_1 = arith.constant 0 : index
    %c0_2 = arith.constant 0 : index
    %1 = vector.load %arg2[%c0_1, %c0_2] : memref<256x256xf32, #tpu.memory_space<vmem>>, vector<256x256xf32>
    %cst = arith.constant dense<0.000000e+00> : vector<32x256xf32>
    %2 = tpu.matmul %0, %1, %cst {dimension_numbers = #tpu.dot_dimension_numbers<[1], [0], [0], [1], [0, 0, 1, 1], [], []>} : vector<32x256xf32>, vector<256x256xf32>, vector<32x256xf32> -> vector<32x256xf32>
    %c0_3 = arith.constant 0 : index
    %c0_4 = arith.constant 0 : index
    %3 = vector.load %arg3[%c0_3, %c0_4] : memref<1x256xf32, #tpu.memory_space<vmem>>, vector<1x256xf32>
    %4 = vector.broadcast %3 : vector<1x256xf32> to vector<32x256xf32>
    %5 = arith.mulf %0, %4 : vector<32x256xf32>
    %6 = arith.subf %2, %5 : vector<32x256xf32>
    %c0_5 = arith.constant 0 : index
    %c0_6 = arith.constant 0 : index
    %7 = vector.load %arg4[%c0_5, %c0_6] : memref<1x256xf32, #tpu.memory_space<vmem>>, vector<1x256xf32>
    %8 = vector.broadcast %7 : vector<1x256xf32> to vector<32x256xf32>
    %9 = arith.addf %6, %8 : vector<32x256xf32>
    %c0_7 = arith.constant 0 : index
    %c0_8 = arith.constant 0 : index
    %10 = vector.load %arg5[%c0_7, %c0_8] : memref<32x256xf32, #tpu.memory_space<vmem>>, vector<32x256xf32>
    tpu.vector_store %arg5[%c0_7, %c0_8], %9 {strides = array<i32>} : memref<32x256xf32, #tpu.memory_space<vmem>>, vector<32x256xf32>,
    return
  }
  func.func @transform_0(%arg0: i32) -> (i32, i32) {
    %c0_i32 = arith.constant 0 : i32
    %c0_i32_0 = arith.constant 0 : i32
    return %arg0, %c0_i32 : i32, i32
  }
  func.func @transform_1(%arg0: i32) -> (i32, i32) {
    %c0_i32 = arith.constant 0 : i32
    %c0_i32_0 = arith.constant 0 : i32
    %c0_i32_1 = arith.constant 0 : i32
    return %c0_i32, %c0_i32_0 : i32, i32
  }
  func.func @transform_2(%arg0: i32) -> (i32, i32) {
    %c0_i32 = arith.constant 0 : i32
    %c0_i32_0 = arith.constant 0 : i32
    %c0_i32_1 = arith.constant 0 : i32
    return %c0_i32, %c0_i32_0 : i32, i32
  }
  func.func @transform_3(%arg0: i32) -> (i32, i32) {
    %c0_i32 = arith.constant 0 : i32
    %c0_i32_0 = arith.constant 0 : i32
    %c0_i32_1 = arith.constant 0 : i32
    return %c0_i32, %c0_i32_0 : i32, i32
  }
  func.func @transform_4(%arg0: i32) -> (i32, i32) {
    %c0_i32 = arith.constant 0 : i32
    %c0_i32_0 = arith.constant 0 : i32
    return %arg0, %c0_i32 : i32, i32
  }
}

</mosaic_0001>

<bundles_post_ra>
// kernel: tpu_custom_call.1
= control target key start
LH: loop header
LB: loop body
LE: loop exit
PB: predicated region body
PF: predicated region fallthrough
CT: control target
= control target key end

     0   :  { %9 = vsyncpa [#allocation3], 0  ;;  %s1125_s0 = inlined_call_operand.hbm [shape: f32[64,256], index: 0, kind: input, shape index: {}]   ;;  %s1126_s1 = inlined_call_operand.hbm [shape: f32[256,256], index: 1, kind: input, shape index: {}]   ;;  %s1127_s2 = inlined_call_operand.vmem [shape: f32[1,256], index: 2, kind: input, shape index: {}]   ;;  %s1128_s3 = inlined_call_operand.vmem [shape: f32[1,256], index: 3, kind: input, shape index: {}]   ;;  %s1129_s4 = inlined_call_operand.hbm [shape: f32[64,256], index: 4, kind: output, shape index: {}]  }
   0x1   :  { %11 = vsyncpa [#allocation3 + $0x1], 0 }
   0x2   :  { %12 = vsyncpa [#allocation6], 0 }
   0x3   :  { %13 = vsyncpa [#allocation4], 0 }
   0x4   :  { %15 = vsyncpa [#allocation4 + $0x1], 0  ;;  %s890_s15 = smov 0   ;;  %s892_s16 = smov 0  }
   0x5   :  { %s894_s17 = smov 0   ;;  %s896_s18 = smov 0  }
   0x6 LB: > { %s911_s19 = sadd.s32 4294967295, %s856_s18   ;;  %s549_s20 = sadd.s32 4294967294, %s856_s18   ;;  %s856_s18 = sphi %s896_s18, %s1149_s18   ;;  %s852_s17 = sphi %s894_s17, %s1148_s17   ;;  %s848_s16 = sphi %s892_s16, %s1147_s16   ;;  %s844_s15 = sphi %s890_s15, %s1146_s15  }
   0x7   : > { %p41_p0 = scmp.ne.s32.totalorder %s848_s16, %s844_s15  ;;  %p1130_p1 = scmp.eq.s32.totalorder %s911_s19, 0 }
   0x8   : > { %p134_p3 = scmp.eq.s32.totalorder %s549_s20, 1  ;;  %p550_p5 = scmp.ge.s32.totalorder %s856_s18, 1 }
   0x9   : > { %p920_p4 = por %p1130_p1, %p41_p0  ;;  %p141_p7 = scmp.lt.s32.totalorder %s856_s18, 3 }
   0xa   : > { %p925_p6 = por %p134_p3, %p41_p0  ;;  %s858_s24 = smov [#allocation5]  }
   0xb   : > { %s1133_s21 = scalar_select %p920_p4, 1, 0 }
   0xc   : > { %s1134_s22 = scalar_select %p925_p6, 1, 0 }
   0xd   : > { %p930_p8 = pnand %p550_p5, %p141_p7  ;;  %s153_s25 = sshll.u32 %s858_s24, 4  ;;  %s934_s25 = int_to_ptr.vmem [resolvable:$true] %s153_s25 }
   0xe   : > { %s946_s27 = sadd.s32 1, %s856_s18   ;;  %s28_s28 = sadd.s32 1, %s852_s17 }
   0xf   : > { %s1135_s23 = scalar_select %p930_p8, 1, 0 }
  0x10   : > { %p675_p9 = pneg %p930_p8  ;;  %s25_s29 = ssub.s32 %s856_s18, %s946_s27 }
  0x11   : > { %s728_s6 = scalar_lea.hbm %s1126_s1, 8192 }
  0x12   : > { %p941_p11 = pnand %p675_p9, %p1130_p1  ;;  %p729_p12 = scmp.ne.s32.totalorder %s1126_s1, %s728_s6 }
  0x13   : > { %p735_p5 = scmp.lt.u32.totalorder %s728_s6, %s1126_s1 }
  0x14   : > { %p730_p13 = pneg %p941_p11 }
  0x16   : > { %p731_p0 = pnand %p730_p13, %p729_p12 }
  0x18   : > { %p732_p3 = pneg %p731_p0 }
  0x1a   : > { %p737_p7 = pnand %p735_p5, %p732_p3 }
  0x1c   : > { %740 = shalt.err (!%p737_p7)
}
  0x1d   : > { %s741_s11 = scalar_lea.vmem %s934_s25, 8192  ;;  %p749_p2 = scmp.lt.s32.totalorder %s934_s25, %s934_s25 }
  0x1e   : > { %p742_p9 = scmp.ne.s32.totalorder %s934_s25, %s741_s11  ;;  %p750_p6 = scmp.lt.s32.totalorder %s741_s11, %s741_s11 }
  0x20   : > { %p744_p10 = pnand %p742_p9, %p730_p13  ;;  %p751_p4 = por %p750_p6, %p749_p2 }
  0x22   : > { %p745_p1 = pneg %p744_p10 }
  0x24   : > { %p752_p8 = pnand %p751_p4, %p745_p1 }
  0x26   : > { %755 = shalt.err (!%p752_p8)
}
  0x27   : > { %s859_s12 = smov 256   ;;  %s860_s13 = smov 16  }
  0x28   : > { %678 = dma.hbm_to_vmem [thread:$0]  (!%p941_p11), %s1126_s1, 8192, %s934_s25, [#allocation6], %s859_s12, %s859_s12, %s860_s13  }
  0x29   : > { %p26_p1 = scmp.eq.s32.totalorder %s25_s29, 0  ;;  %p35_p2 = scmp.ne.s32.totalorder %s852_s17, %s848_s16 }
  0x2a   : > { %p36_p4 = scmp.eq.s32.totalorder %s856_s18, 0  ;;  %p688_p6 = scmp.lt.s32.totalorder %s856_s18, 2 }
  0x2b   : > { %s980_s24 = scalar_select %p26_p1, %s852_s17, %s28_s28  }
  0x2c   : > { %p37_p8 = por %p36_p4, %p35_p2  ;;  %p1137_p10 = scmp.eq.s32.totalorder %s911_s19, 1 }
  0x2d   : > { %s173_s26 = sand.u32 1, %s852_s17   ;;  %s568_s5 = sshll.u32 %s856_s18, 10 }
  0x2e   : > { %p984_p12 = por %p1137_p10, %p35_p2  ;;  %s553_s6 = sshll.u32 %s173_s26, 6 }
  0x2f   : > { %s993_s9 = scalar_lea.hbm %s1125_s0, %s568_s5  ;;  %s177_s25 = scalar_lea.vmem [#allocation2], %s553_s6 }
  0x30   : > { %s185_s28 = sshll.u32 %s177_s25, 4  ;;  %p995_p11 = pnand %p688_p6, %p37_p8  ;;  %s999_s28 = int_to_ptr.vmem [resolvable:$true] %s185_s28 }
  0x31   : > { %s1001_s10 = scalar_lea.sflag [#allocation3], %s173_s26  ;;  %s756_s11 = scalar_lea.hbm %s993_s9, 1024 }
  0x32   : > { %p757_p13 = scmp.ne.s32.totalorder %s993_s9, %s756_s11  ;;  %p758_p0 = pneg %p995_p11 }
  0x33   : > { %s761_s5 = scalar_lea.hbm %s1125_s0, 2048  ;;  %p762_p7 = scmp.lt.u32.totalorder %s993_s9, %s1125_s0 }
  0x34   : > { %p759_p3 = pnand %p758_p0, %p757_p13  ;;  %p763_p9 = scmp.lt.u32.totalorder %s761_s5, %s756_s11 }
  0x35   : > { %p765_p2 = scmp.lt.u32.totalorder %s756_s11, %s993_s9 }
  0x36   : > { %p760_p5 = pneg %p759_p3  ;;  %p764_p1 = por %p763_p9, %p762_p7 }
  0x38   : > { %p766_p4 = por %p765_p2, %p764_p1 }
  0x3a   : > { %p767_p6 = pnand %p766_p4, %p760_p5 }
  0x3c   : > { %770 = shalt.err (!%p767_p6)
}
  0x3d   : > { %s771_s26 = scalar_lea.vmem %s999_s28, 1024  ;;  %s861_s8 = smov [#allocation2]  }
  0x3e   : > { %p772_p8 = scmp.ne.s32.totalorder %s999_s28, %s771_s26  ;;  %s776_s25 = sshll.u32 %s861_s8, 4  ;;  %s777_s25 = int_to_ptr.vmem [resolvable:$false] %s776_s25 }
  0x3f   : > { %s778_s14 = scalar_lea.vmem %s777_s25, 2048  ;;  %p779_p3 = scmp.lt.s32.totalorder %s999_s28, %s777_s25 }
  0x40   : > { %p774_p10 = pnand %p772_p8, %p758_p0  ;;  %p780_p7 = scmp.lt.s32.totalorder %s778_s14, %s771_s26 }
  0x42   : > { %p775_p13 = pneg %p774_p10  ;;  %p781_p9 = por %p780_p7, %p779_p3 }
  0x44   : > { %p782_p1 = pnand %p781_p9, %p775_p13 }
  0x46   : > { %785 = shalt.err (!%p782_p1)
}
  0x47   : > { %682 = dma.hbm_to_vmem [thread:$0]  (!%p995_p11), %s993_s9, 1024, %s999_s28, %s1001_s10, %s859_s12, %s859_s12, %s860_s13  }
  0x48   : > { %p1140_p0 = scmp.ne.s32.totalorder %s1135_s23, 0 }
  0x49   : > { %s1035_s11 = sand.u32 (!%p1140_p0), 1, %s848_s16   ;;  %p1141_p5 = scmp.ne.s32.totalorder (!%p1140_p0), %s1133_s21, 0 }
  0x4a   : > { %197 = sbr.rel (%p1140_p0) target bundleno = 388 (0x184), region = 36  ;;  %s558_s20 = sshll.u32 (!%p1140_p0), %s1035_s11, 6 }
  0x4b   : > { %s200_s5 = scalar_lea.sflag (!%p1140_p0), [#allocation3], %s1035_s11  ;;  %s1041_s29 = scalar_lea.vmem (!%p1140_p0), [#allocation2], %s558_s20 }
  0x51   : > { %831 = dma.done.wait (%p1141_p5), %s200_s5, 1024  }
  0x52   : > { %833 = vsyncadd (%p1141_p5), %s200_s5, 4294966272  ;;  %p1142_p11 = scmp.eq.s32.totalorder %s911_s19, 0 }
  0x54   : > { %835 = dma.done.wait (%p1142_p11), [#allocation6], 8192   ;;  %p1143_p2 = pmov %p1142_p11 }
  0x55   : > { %v243_v0 = vld [vmem:[#allocation5 + $0x8] sm:$0xff]  ;;  %v245_v1 = vld [vmem:[#allocation5 + $0x18] sm:$0xff]  ;;  %v242_v2 = vld [vmem:[#allocation5] sm:$0xff]  ;;  %s231_s9 = scalar_lea.vmem [#allocation7], %s558_s20  ;;  %s570_s10 = sshll.u32 %s911_s19, 10 }
  0x56   : > { %837 = vsyncadd (%p1143_p2), [#allocation6], 4294959104  ;;  %v571_v3 = vpack.c.bf16 %v245_v1, %v243_v0  ;;  %v244_v4 = vld [vmem:[#allocation5 + $0x10] sm:$0xff]  ;;  %v247_v5 = vld [vmem:[#allocation5 + $0x28] sm:$0xff]  ;;  %s466_s28 = sshll.u32 %s231_s9, 4  ;;  %s1081_s7 = scalar_lea.hbm %s1129_s4, %s570_s10  ;;  %s1076_s28 = int_to_ptr.vmem [resolvable:$true] %s466_s28 }
  0x57   : > { %v249_v6 = vld [vmem:[#allocation5 + $0x38] sm:$0xff]  ;;  %v573_v7 = vpack.c.bf16 %v244_v4, %v242_v2  ;;  %v246_v9 = vld [vmem:[#allocation5 + $0x20] sm:$0xff]  ;;  %v248_v10 = vld [vmem:[#allocation5 + $0x30] sm:$0xff]  ;;  %s452_s26 = scalar_lea.sflag [#allocation4], %s1035_s11  ;;  %s786_s8 = scalar_lea.vmem %s1076_s28, 1024 }
  0x58   : > { %v575_v8 = vpack.c.bf16 %v249_v6, %v247_v5  ;;  %v251_v11 = vld [vmem:[#allocation5 + $0x48] sm:$0xff]  ;;  %572 = vmatprep.subr.bf16.mxu0 %v571_v3  ;;  %635 = vmatprep.subr.bf16.mxu1 %v571_v3  ;;  %v253_v12 = vld [vmem:[#allocation5 + $0x58] sm:$0xff]  ;;  %v577_v13 = vpack.c.bf16 %v248_v10, %v246_v9  ;;  %v250_v15 = vld [vmem:[#allocation5 + $0x40] sm:$0xff]  ;;  %p787_p4 = scmp.ne.s32.totalorder %s1076_s28, %s786_s8  ;;  %s862_s25 = smov [#allocation7]  }
  0x59   : > { %574 = vmatpush1.bf16.msra.mxu0 %v573_v7  ;;  %651 = vmatpush1.bf16.msra.mxu1 %v573_v7  ;;  %v579_v14 = vpack.c.bf16 %v253_v12, %v251_v11  ;;  %v252_v16 = vld [vmem:[#allocation5 + $0x50] sm:$0xff]  ;;  %v255_v17 = vld [vmem:[#allocation5 + $0x68] sm:$0xff]  ;;  %v257_v18 = vld [vmem:[#allocation5 + $0x78] sm:$0xff]  ;;  %s790_s14 = sshll.u32 %s862_s25, 4  ;;  %s791_s14 = int_to_ptr.vmem [resolvable:$false] %s790_s14 }
  0x5a   : > { %576 = vmatprep.subr.bf16.mxu0 %v575_v8  ;;  %636 = vmatprep.subr.bf16.mxu1 %v575_v8  ;;  %v581_v19 = vpack.c.bf16 %v252_v16, %v250_v15  ;;  %v583_v20 = vpack.c.bf16 %v257_v18, %v255_v17  ;;  %v254_v21 = vld [vmem:[#allocation5 + $0x60] sm:$0xff]  ;;  %v256_v22 = vld [vmem:[#allocation5 + $0x70] sm:$0xff]  ;;  %v259_v23 = vld [vmem:[#allocation5 + $0x88] sm:$0xff]  ;;  %p788_p6 = pnand %p787_p4, %p984_p12  ;;  %s792_s20 = scalar_lea.vmem %s791_s14, 2048 }
  0x5b   : > { %v261_v24 = vld [vmem:[#allocation5 + $0x98] sm:$0xff]  ;;  %v585_v25 = vpack.c.bf16 %v256_v22, %v254_v21  ;;  %v258_v27 = vld [vmem:[#allocation5 + $0x80] sm:$0xff]  ;;  %v260_v28 = vld [vmem:[#allocation5 + $0x90] sm:$0xff]  ;;  %p793_p10 = scmp.lt.s32.totalorder %s1076_s28, %s791_s14  ;;  %p794_p13 = scmp.lt.s32.totalorder %s792_s20, %s786_s8 }
  0x5c   : > { %v587_v26 = vpack.c.bf16 %v261_v24, %v259_v23  ;;  %v263_v29 = vld [vmem:[#allocation5 + $0xa8] sm:$0xff]  ;;  %v265_v30 = vld [vmem:[#allocation5 + $0xb8] sm:$0xff]  ;;  %v589_v31 = vpack.c.bf16 %v260_v28, %v258_v27  ;;  %v262_v33 = vld [vmem:[#allocation5 + $0xa0] sm:$0xff]  ;;  %p789_p8 = pneg %p788_p6 }
  0x5d   : > { %578 = vmatpush1.bf16.msra.mxu0 %v577_v13  ;;  %652 = vmatpush1.bf16.msra.mxu1 %v577_v13  ;;  %v591_v32 = vpack.c.bf16 %v265_v30, %v263_v29  ;;  %v264_v34 = vld [vmem:[#allocation5 + $0xb0] sm:$0xff]  ;;  %v267_v35 = vld [vmem:[#allocation5 + $0xc8] sm:$0xff]  ;;  %v269_v36 = vld [vmem:[#allocation5 + $0xd8] sm:$0xff]  ;;  %p795_p3 = por %p794_p13, %p793_p10 }
  0x5e   : > { %580 = vmatprep.subr.bf16.mxu0 %v579_v14  ;;  %637 = vmatprep.subr.bf16.mxu1 %v579_v14  ;;  %v593_v37 = vpack.c.bf16 %v264_v34, %v262_v33  ;;  %v595_v38 = vpack.c.bf16 %v269_v36, %v267_v35  ;;  %v266_v39 = vld [vmem:[#allocation5 + $0xc0] sm:$0xff]  ;;  %v268_v40 = vld [vmem:[#allocation5 + $0xd0] sm:$0xff]  ;;  %v1052_v41 = vld [vmem:[%s1041_s29 + $0x8] sm:$0xff] }
  0x5f   : > { %v271_v42 = vld [vmem:[#allocation5 + $0xe8] sm:$0xff]  ;;  %v273_v43 = vld [vmem:[#allocation5 + $0xf8] sm:$0xff]  ;;  %370 = vmatprep.mubr.f32.mxu0 %v1052_v41  ;;  %v597_v45 = vpack.c.bf16 %v268_v40, %v266_v39  ;;  %v270_v47 = vld [vmem:[#allocation5 + $0xe0] sm:$0xff]  ;;  %v397_v40 = vlaneseq  ;;  %p796_p7 = pnand %p795_p3, %p789_p8 }
  0x60   : > { %v1056_v44 = vld [vmem:[%s1041_s29 + $0x28] sm:$0xff]  ;;  %v599_v46 = vpack.c.bf16 %v273_v43, %v271_v42  ;;  %v272_v48 = vld [vmem:[#allocation5 + $0xf0] sm:$0xff]  ;;  %v277_v50 = vld [vmem:[#allocation5 + $0x118] sm:$0xff] }
  0x61   : > { %582 = vmatpush1.bf16.msra.mxu0 %v581_v19  ;;  %653 = vmatpush1.bf16.msra.mxu1 %v581_v19  ;;  %v275_v49 = vld [vmem:[#allocation5 + $0x108] sm:$0xff]  ;;  %v601_v51 = vpack.c.bf16 %v272_v48, %v270_v47  ;;  %v274_v53 = vld [vmem:[#allocation5 + $0x100] sm:$0xff]  ;;  %v276_v54 = vld [vmem:[#allocation5 + $0x110] sm:$0xff]  ;;  %v398_v42 = vshrl.u32 %v397_v40, 7 }
  0x62   : > { %584 = vmatprep.subr.bf16.mxu0 %v583_v20  ;;  %638 = vmatprep.subr.bf16.mxu1 %v583_v20  ;;  %v603_v52 = vpack.c.bf16 %v277_v50, %v275_v49  ;;  %v279_v55 = vld [vmem:[#allocation5 + $0x128] sm:$0xff]  ;;  %v281_v56 = vld [vmem:[#allocation5 + $0x138] sm:$0xff]  ;;  %v605_v57 = vpack.c.bf16 %v276_v54, %v274_v53  ;;  %v278_v59 = vld [vmem:[#allocation5 + $0x120] sm:$0xff] }
  0x63   : > { %382 = vmatprep.mubr.f32.mxu1 %v1056_v44  ;;  %v607_v58 = vpack.c.bf16 %v281_v56, %v279_v55  ;;  %v280_v60 = vld [vmem:[#allocation5 + $0x130] sm:$0xff]  ;;  %v283_v61 = vld [vmem:[#allocation5 + $0x148] sm:$0xff]  ;;  %v285_v62 = vld [vmem:[#allocation5 + $0x158] sm:$0xff]  ;;  %v399_v43 = vsub.s32 0, %v398_v42 }
  0x64   : > { %v609_v63 = vpack.c.bf16 %v280_v60, %v278_v59  ;;  %v611_v0 = vpack.c.bf16 %v285_v62, %v283_v61  ;;  %v282_v1 = vld [vmem:[#allocation5 + $0x140] sm:$0xff]  ;;  %v284_v2 = vld [vmem:[#allocation5 + $0x150] sm:$0xff]  ;;  %v287_v3 = vld [vmem:[#allocation5 + $0x168] sm:$0xff] }
  0x65   : > { %586 = vmatpush1.bf16.msra.mxu0 %v585_v25  ;;  %654 = vmatpush1.bf16.msra.mxu1 %v585_v25  ;;  %v289_v4 = vld [vmem:[#allocation5 + $0x178] sm:$0xff]  ;;  %v613_v5 = vpack.c.bf16 %v284_v2, %v282_v1  ;;  %v286_v7 = vld [vmem:[#allocation5 + $0x160] sm:$0xff]  ;;  %v288_v8 = vld [vmem:[#allocation5 + $0x170] sm:$0xff] }
  0x66   : > { %588 = vmatprep.subr.bf16.mxu0 %v587_v26  ;;  %639 = vmatprep.subr.bf16.mxu1 %v587_v26  ;;  %v615_v6 = vpack.c.bf16 %v289_v4, %v287_v3  ;;  %v291_v9 = vld [vmem:[#allocation5 + $0x188] sm:$0xff]  ;;  %v293_v10 = vld [vmem:[#allocation5 + $0x198] sm:$0xff]  ;;  %v617_v11 = vpack.c.bf16 %v288_v8, %v286_v7  ;;  %v290_v13 = vld [vmem:[#allocation5 + $0x180] sm:$0xff] }
  0x67   : > { %v619_v12 = vpack.c.bf16 %v293_v10, %v291_v9  ;;  %v292_v14 = vld [vmem:[#allocation5 + $0x190] sm:$0xff]  ;;  %v295_v15 = vld [vmem:[#allocation5 + $0x1a8] sm:$0xff]  ;;  %v297_v16 = vld [vmem:[#allocation5 + $0x1b8] sm:$0xff] }
  0x68   : > { %v621_v17 = vpack.c.bf16 %v292_v14, %v290_v13  ;;  %v623_v18 = vpack.c.bf16 %v297_v16, %v295_v15  ;;  %v294_v19 = vld [vmem:[#allocation5 + $0x1a0] sm:$0xff]  ;;  %v296_v20 = vld [vmem:[#allocation5 + $0x1b0] sm:$0xff]  ;;  %v299_v21 = vld [vmem:[#allocation5 + $0x1c8] sm:$0xff] }
  0x69   : > { %590 = vmatpush1.bf16.msra.mxu0 %v589_v31  ;;  %655 = vmatpush1.bf16.msra.mxu1 %v589_v31  ;;  %v301_v22 = vld [vmem:[#allocation5 + $0x1d8] sm:$0xff]  ;;  %v625_v23 = vpack.c.bf16 %v296_v20, %v294_v19  ;;  %v298_v25 = vld [vmem:[#allocation5 + $0x1c0] sm:$0xff]  ;;  %v300_v26 = vld [vmem:[#allocation5 + $0x1d0] sm:$0xff] }
  0x6a   : > { %592 = vmatprep.subr.bf16.mxu0 %v591_v32  ;;  %640 = vmatprep.subr.bf16.mxu1 %v591_v32  ;;  %v627_v24 = vpack.c.bf16 %v301_v22, %v299_v21  ;;  %v303_v27 = vld [vmem:[#allocation5 + $0x1e8] sm:$0xff]  ;;  %v305_v28 = vld [vmem:[#allocation5 + $0x1f8] sm:$0xff]  ;;  %v629_v29 = vpack.c.bf16 %v300_v26, %v298_v25  ;;  %v302_v31 = vld [vmem:[#allocation5 + $0x1e0] sm:$0xff] }
  0x6b   : > { %v631_v30 = vpack.c.bf16 %v305_v28, %v303_v27  ;;  %v304_v32 = vld [vmem:[#allocation5 + $0x1f0] sm:$0xff]  ;;  %v234_v34 = vld [vmem:[%s1041_s29] sm:$0xff]  ;;  %v237_v36 = vld [vmem:[%s1041_s29 + $0x18] sm:$0xff] }
  0x6c   : > { %v633_v33 = vpack.c.bf16 %v304_v32, %v302_v31  ;;  %v238_v35 = vld [vmem:[%s1041_s29 + $0x20] sm:$0xff]  ;;  %v240_v39 = vld [vmem:[%s1041_s29 + $0x30] sm:$0xff] }
  0x6d   : > { %594 = vmatpush1.bf16.msra.mxu0 %v593_v37  ;;  %656 = vmatpush1.bf16.msra.mxu1 %v593_v37  ;;  %v241_v37 = vld [vmem:[%s1041_s29 + $0x38] sm:$0xff]  ;;  %v423_v49 = vld [vmem:[%s1128_s3] sm:$0x3] }
  0x6e   : > { %596 = vmatprep.subr.bf16.mxu0 %v595_v38  ;;  %641 = vmatprep.subr.bf16.mxu1 %v595_v38  ;;  %v236_v38 = vld [vmem:[%s1041_s29 + $0x10] sm:$0xff]  ;;  %v428_v54 = vrot.slane %v423_v49, %v399_v43 }
  0x71   : > { %598 = vmatpush1.bf16.msra.mxu0 %v597_v45  ;;  %657 = vmatpush1.bf16.msra.mxu1 %v597_v45  ;;  %v395_v45 = vld [vmem:[%s1127_s2] sm:$0x3] }
  0x72   : > { %600 = vmatprep.subr.bf16.mxu0 %v599_v46  ;;  %642 = vmatprep.subr.bf16.mxu1 %v599_v46  ;;  %v403_v46 = vsub.s32 1, %v398_v42  ;;  %v400_v47 = vrot.slane %v395_v45, %v399_v43 }
  0x74   : > { %v404_v48 = vrot.slane %v395_v45, %v403_v46  ;;  %v407_v50 = vmul.f32 %v400_v47, %v234_v34  ;;  %v409_v62 = vmul.f32 %v400_v47, %v236_v38 }
  0x75   : > { %602 = vmatpush1.bf16.msra.mxu0 %v601_v51  ;;  %658 = vmatpush1.bf16.msra.mxu1 %v601_v51  ;;  %v411_v51 = vmul.f32 %v400_v47, %v238_v35 }
  0x76   : > { %604 = vmatprep.subr.bf16.mxu0 %v603_v52  ;;  %643 = vmatprep.subr.bf16.mxu1 %v603_v52  ;;  %v408_v52 = vmul.f32 %v404_v48, %v1052_v41  ;;  %v412_v53 = vmul.f32 %v404_v48, %v1056_v44  ;;  %v410_v2 = vmul.f32 %v404_v48, %v237_v36 }
  0x77   : > { %v414_v3 = vmul.f32 %v404_v48, %v241_v37 }
  0x79   : > { %606 = vmatpush1.bf16.msra.mxu0 %v605_v57  ;;  %659 = vmatpush1.bf16.msra.mxu1 %v605_v57  ;;  %v432_v57 = vrot.slane %v423_v49, %v403_v46 }
  0x7a   : > { %608 = vmatprep.subr.bf16.mxu0 %v607_v58  ;;  %644 = vmatprep.subr.bf16.mxu1 %v607_v58 }
  0x7d   : > { %610 = vmatpush1.bf16.msra.mxu0 %v609_v63  ;;  %660 = vmatpush1.bf16.msra.mxu1 %v609_v63  ;;  %v413_v63 = vmul.f32 %v400_v47, %v240_v39 }
  0x7e   : > { %612 = vmatprep.subr.bf16.mxu0 %v611_v0  ;;  %645 = vmatprep.subr.bf16.mxu1 %v611_v0 }
  0x81   : > { %614 = vmatpush1.bf16.msra.mxu0 %v613_v5  ;;  %661 = vmatpush1.bf16.msra.mxu1 %v613_v5 }
  0x82   : > { %616 = vmatprep.subr.bf16.mxu0 %v615_v6  ;;  %646 = vmatprep.subr.bf16.mxu1 %v615_v6 }
  0x85   : > { %618 = vmatpush1.bf16.msra.mxu0 %v617_v11  ;;  %662 = vmatpush1.bf16.msra.mxu1 %v617_v11 }
  0x86   : > { %620 = vmatprep.subr.bf16.mxu0 %v619_v12  ;;  %647 = vmatprep.subr.bf16.mxu1 %v619_v12 }
  0x89   : > { %622 = vmatpush1.bf16.msra.mxu0 %v621_v17  ;;  %663 = vmatpush1.bf16.msra.mxu1 %v621_v17 }
  0x8a   : > { %624 = vmatprep.subr.bf16.mxu0 %v623_v18  ;;  %648 = vmatprep.subr.bf16.mxu1 %v623_v18 }
  0x8d   : > { %626 = vmatpush1.bf16.msra.mxu0 %v625_v23  ;;  %664 = vmatpush1.bf16.msra.mxu1 %v625_v23 }
  0x8e   : > { %628 = vmatprep.subr.bf16.mxu0 %v627_v24  ;;  %649 = vmatprep.subr.bf16.mxu1 %v627_v24 }
  0x91   : > { %630 = vmatpush1.bf16.msra.mxu0 %v629_v29  ;;  %665 = vmatpush1.bf16.msra.mxu1 %v629_v29 }
  0x92   : > { %632 = vmatprep.subr.bf16.mxu0 %v631_v30  ;;  %650 = vmatprep.subr.bf16.mxu1 %v631_v30 }
  0x95   : > { %634 = vmatpush1.bf16.msra.mxu0 %v633_v33  ;;  %666 = vmatpush1.bf16.msra.mxu1 %v633_v33 }
  0x98   : > { %371 = vmatmul.mubr.f32.vlgmr.msra.gmra.mrb[0].mxu0 %v234_v34  ;;  %383 = vmatmul.mubr.f32.vlgmr.msra.gmra.mrb[0].mxu1 %v238_v35 }
  0x99   : > { %376 = vmatprep.mubr.f32.mxu0 %v237_v36  ;;  %388 = vmatprep.mubr.f32.mxu1 %v241_v37 }
  0x9c   : > { %377 = vmatmul.mubr.f32.gmra.mrb[2].mxu0 %v236_v38  ;;  %389 = vmatmul.mubr.f32.gmra.mrb[2].mxu1 %v240_v39 }
 0x16b   : > { %v372_v55 = vpop.f32.mrb[0].mxu0  ;;  %v384_v56 = vpop.f32.mrb[0].mxu1 }
 0x16c   : > { %v415_v58 = vsub.f32 %v372_v55, %v407_v50  ;;  %v419_v59 = vsub.f32 %v384_v56, %v411_v51  ;;  %v374_v60 = vpop.f32.mrb[1].mxu0  ;;  %v386_v61 = vpop.f32.mrb[1].mxu1 }
 0x16d   : > { %v416_v0 = vsub.f32 %v374_v60, %v408_v52  ;;  %v420_v1 = vsub.f32 %v386_v61, %v412_v53 }
 0x16e   : > { %v435_v4 = vadd.f32 %v428_v54, %v415_v58  ;;  %v439_v41 = vadd.f32 %v428_v54, %v419_v59 }
 0x16f   : > { %v436_v44 = vadd.f32 %v432_v57, %v416_v0  ;;  %v440_v5 = vadd.f32 %v432_v57, %v420_v1  ;;  %v378_v6 = vpop.f32.mrb[2].mxu0  ;;  %v390_v7 = vpop.f32.mrb[2].mxu1 }
 0x170   : > { %443 = vst [vmem:[%s231_s9] sm:$0xff] %v435_v4  ;;  %447 = vst [vmem:[%s231_s9 + $0x20] sm:$0xff] %v439_v41  ;;  %v417_v8 = vsub.f32 %v378_v6, %v409_v62  ;;  %v421_v9 = vsub.f32 %v390_v7, %v413_v63  ;;  %v380_v10 = vpop.f32.mrb[3].mxu0  ;;  %v392_v11 = vpop.f32.mrb[3].mxu1 }
 0x171   : > { %444 = vst [vmem:[%s231_s9 + $0x8] sm:$0xff] %v436_v44  ;;  %448 = vst [vmem:[%s231_s9 + $0x28] sm:$0xff] %v440_v5  ;;  %v418_v12 = vsub.f32 %v380_v10, %v410_v2  ;;  %v422_v13 = vsub.f32 %v392_v11, %v414_v3 }
 0x172   : > { %v437_v14 = vadd.f32 %v428_v54, %v417_v8  ;;  %v441_v15 = vadd.f32 %v428_v54, %v421_v9 }
 0x173   : > { %v438_v16 = vadd.f32 %v432_v57, %v418_v12  ;;  %v442_v17 = vadd.f32 %v432_v57, %v422_v13 }
 0x174   : > { %445 = vst [vmem:[%s231_s9 + $0x10] sm:$0xff] %v437_v14  ;;  %449 = vst [vmem:[%s231_s9 + $0x30] sm:$0xff] %v441_v15 }
 0x175   : > { %446 = vst [vmem:[%s231_s9 + $0x18] sm:$0xff] %v438_v16  ;;  %450 = vst [vmem:[%s231_s9 + $0x38] sm:$0xff] %v442_v17 }
 0x176   : > { %799 = shalt.err (!%p796_p7)
}
 0x177   : > { %s800_s5 = scalar_lea.hbm %s1081_s7, 1024  ;;  %s804_s23 = scalar_lea.hbm %s1129_s4, 2048 }
 0x178   : > { %p801_p9 = scmp.ne.s32.totalorder %s1081_s7, %s800_s5  ;;  %p805_p5 = scmp.lt.u32.totalorder %s1081_s7, %s1129_s4 }
 0x179   : > { %p806_p11 = scmp.lt.u32.totalorder %s804_s23, %s800_s5  ;;  %p808_p4 = scmp.lt.u32.totalorder %s800_s5, %s1081_s7 }
 0x17a   : > { %p802_p1 = pnand %p801_p9, %p984_p12 }
 0x17b   : > { %p807_p2 = por %p806_p11, %p805_p5 }
 0x17c   : > { %p803_p0 = pneg %p802_p1 }
 0x17d   : > { %p809_p6 = por %p808_p4, %p807_p2 }
 0x17f   : > { %p810_p8 = pnand %p809_p6, %p803_p0 }
 0x181   : > { %813 = shalt.err (!%p810_p8)
}
 0x182   : > { %s863_s9 = smov 256   ;;  %s864_s10 = smov 16  }
 0x183   : > { %673 = dma.vmem_to_hbm [thread:$0]  (%p984_p12), %s1076_s28, 1024, %s1081_s7, %s452_s26, %s863_s9, %s863_s9, %s864_s10  }
 0x184 PF: > { %s481_s6 = sand.u32 1, %s844_s15   ;;  %p1144_p10 = scmp.ne.s32.totalorder %s1134_s22, 0 }
 0x185   : > { %p1145_p13 = scmp.ge.s32.totalorder %s856_s18, 2  ;;  %s482_s19 = scalar_lea.sflag [#allocation4], %s481_s6 }
 0x187   : > { %p684_p3 = pnand %p1145_p13, %p1144_p10 }
 0x189   : > { %839 = dma.done.wait (!%p684_p3), %s482_s19, 1024  }
 0x18a   : > { %841 = vsyncadd (!%p684_p3), %s482_s19, 4294966272  ;;  %p18_p7 = scmp.ge.s32.totalorder %s946_s27, 4   ;;  %s1146_s15 = smov %s848_s16 }
 0x18b   : > { %s1147_s16 = smov %s852_s17  ;;  %s1148_s17 = smov %s980_s24 }
 0x18c   : > { %s1149_s18 = smov %s946_s27  ;;  %20 = sbr.rel (!%p18_p7) target bundleno = 6 (0x6), region = 85 }
 0x193   :  { %487 = vsyncpa [#allocation3], 1 }
 0x194   :  { %489 = vsyncpa [#allocation3 + $0x1], 1 }
 0x195   :  { %490 = vsyncpa [#allocation6], 1 }
 0x196   :  { %491 = vsyncpa [#allocation4], 1 }
 0x197   :  { %493 = vsyncpa [#allocation4 + $0x1], 1 }

</bundles_post_ra>
